<compile_context>
chip_gen: v7x
topology: tpu7x:2x2x1
jax: 0.10.0
libtpu: 0.0.40
codegen_flags: <defaults>
</compile_context>

<pallas_src>
import jax
import jax.numpy as jnp
from jax.experimental import pallas as pl
from jax.experimental.pallas import tpu as pltpu

_ACTUAL_OBS_DIM = 16
_HID = 256


def _actor_kernel(x_ref, w1_ref, b1_ref, w2_ref, b2_ref,
                  wmu_ref, bmu_ref, scale_ref, bias_ref, o_ref):
    # Slice the first 16 features inside the kernel (static slice, no wrapper op).
    x = x_ref[:, :_ACTUAL_OBS_DIM].astype(jnp.bfloat16)          # [TM, 16] bf16

    # fc1 + relu   (bf16 MXU inputs, f32 accumulation, f32 epilogue)
    h1 = jnp.dot(x, w1_ref[...], preferred_element_type=jnp.float32) + b1_ref[...]
    h1 = jnp.maximum(h1, 0.0)

    # fc2 + relu
    h2 = jnp.dot(h1.astype(jnp.bfloat16), w2_ref[...],
                 preferred_element_type=jnp.float32) + b2_ref[...]
    h2 = jnp.maximum(h2, 0.0)

    # fc_mu + tanh + affine rescale to action bounds (all f32 elementwise).
    mu = jnp.tanh(jnp.dot(h2.astype(jnp.bfloat16), wmu_ref[...],
                          preferred_element_type=jnp.float32) + bmu_ref[...])
    o_ref[...] = mu * scale_ref[...] + bias_ref[...]


def unicycle_actor_forward(x, params):
    """x: [B, obs_dim] float32 (obs_dim >= 16).  Returns [B, action_dim] float32."""
    B, obs_dim = x.shape
    assert obs_dim >= _ACTUAL_OBS_DIM, (
        f"obs_dim={obs_dim} must be >= {_ACTUAL_OBS_DIM}")
    action_dim = params["w_mu"].shape[1]

    # Batch tile: one block if B is small, else 1024-row blocks (multiple of 8 and
    # of 256; per-block f32 activations ~2 MB -> safe for v7x's 64 MiB VMEM).
    TM = B if B <= 1024 else 1024
    grid = (pl.cdiv(B, TM),)

    const = lambda i: (0, 0)           # weights/biases: DMA once, stay resident
    batched = lambda i: (i, 0)         # x / out: tiled along the batch axis

    weight_bytes = sum(int(params[k].size) * params[k].dtype.itemsize
                       for k in ("w1", "b1", "w2", "b2", "w_mu", "b_mu",
                                 "action_scale", "action_bias"))
    cost = pl.CostEstimate(
        flops=2 * B * (_ACTUAL_OBS_DIM * _HID + _HID * _HID + _HID * action_dim),
        transcendentals=B * action_dim,                     # tanh
        bytes_accessed=x.size * x.dtype.itemsize
        + B * action_dim * 4 + weight_bytes,
    )

    return pl.pallas_call(
        _actor_kernel,
        out_shape=jax.ShapeDtypeStruct((B, action_dim), jnp.float32),
        grid_spec=pltpu.PrefetchScalarGridSpec(
            num_scalar_prefetch=0,
            grid=grid,
            in_specs=[
                pl.BlockSpec((TM, obs_dim), batched),            # x
                pl.BlockSpec((_ACTUAL_OBS_DIM, _HID), const),    # w1 (bf16)
                pl.BlockSpec((1, _HID), const),                  # b1
                pl.BlockSpec((_HID, _HID), const),               # w2 (bf16)
                pl.BlockSpec((1, _HID), const),                  # b2
                pl.BlockSpec((_HID, action_dim), const),         # w_mu (bf16)
                pl.BlockSpec((1, action_dim), const),            # b_mu
                pl.BlockSpec((1, action_dim), const),            # action_scale
                pl.BlockSpec((1, action_dim), const),            # action_bias
            ],
            out_specs=pl.BlockSpec((TM, action_dim), batched),
        ),
        compiler_params=pltpu.CompilerParams(
            dimension_semantics=("parallel",),                   # megacore on v7x
        ),
        cost_estimate=cost,
    )(x,
      params["w1"], params["b1"],
      params["w2"], params["b2"],
      params["w_mu"], params["b_mu"],
      params["action_scale"], params["action_bias"])


def init_params(key, action_dim=2, u_max=None, u_min=None):
    """Deterministic synthetic initialization (same shapes as the nn.Module).

    Weights are stored in bfloat16 (halves weight DMA, native MXU path);
    biases / action scale+bias stay float32 and are kept 2-D for clean broadcast.
    """
    if u_max is None:
        u_max = jnp.array([1.0, 2.0], dtype=jnp.float32)[:action_dim]
    if u_min is None:
        u_min = jnp.array([-1.0, -2.0], dtype=jnp.float32)[:action_dim]
    k1, k2, k3 = jax.random.split(key, 3)
    obs, hid = _ACTUAL_OBS_DIM, _HID
    return {
        "w1":  (jax.random.normal(k1, (obs, hid), jnp.float32) * 0.05).astype(jnp.bfloat16),
        "b1":  jnp.zeros((1, hid), jnp.float32),
        "w2":  (jax.random.normal(k2, (hid, hid), jnp.float32) * 0.05).astype(jnp.bfloat16),
        "b2":  jnp.zeros((1, hid), jnp.float32),
        "w_mu": (jax.random.normal(k3, (hid, action_dim), jnp.float32) * 0.05).astype(jnp.bfloat16),
        "b_mu": jnp.zeros((1, action_dim), jnp.float32),
        "action_scale": ((u_max - u_min) / 2.0).reshape(1, action_dim).astype(jnp.float32),
        "action_bias":  ((u_max + u_min) / 2.0).reshape(1, action_dim).astype(jnp.float32),
    }


def _reference(x, p):
    """Pure-JAX reference mirroring the kernel's bf16-input / f32-accumulate math."""
    bf = lambda a: a.astype(jnp.bfloat16).astype(jnp.float32)
    x16 = bf(x[:, :_ACTUAL_OBS_DIM])
    h1 = jax.nn.relu(x16 @ p["w1"].astype(jnp.float32) + p["b1"])
    h2 = jax.nn.relu(bf(h1) @ p["w2"].astype(jnp.float32) + p["b2"])
    mu = jnp.tanh(bf(h2) @ p["w_mu"].astype(jnp.float32) + p["b_mu"])
    return mu * p["action_scale"] + p["action_bias"]


if __name__ == "__main__":
    key = jax.random.PRNGKey(0)
    kx, kp = jax.random.split(key)

    batch = 8
    obs_dim = 20        # forward slices to the first 16 features (inside kernel)
    action_dim = 2

    x = jax.random.normal(kx, (batch, obs_dim), dtype=jnp.float32)
    params = init_params(kp, action_dim=action_dim)

    out = unicycle_actor_forward(x, params)
    out = jax.block_until_ready(out)

    ref = _reference(x, params)
    assert out.shape == (batch, action_dim)
    assert jnp.allclose(out, ref, atol=1e-4, rtol=1e-4)

    print("KERNEL_OK")
</pallas_src>

<mosaic_0001>
module attributes {stable_mosaic.version = 11 : i64} {
  func.func @_actor_kernel(%arg0: i32, %arg1: memref<8x20xf32, #tpu.memory_space<vmem>>, %arg2: memref<16x256xbf16, #tpu.memory_space<vmem>>, %arg3: memref<1x256xf32, #tpu.memory_space<vmem>>, %arg4: memref<256x256xbf16, #tpu.memory_space<vmem>>, %arg5: memref<1x256xf32, #tpu.memory_space<vmem>>, %arg6: memref<256x2xbf16, #tpu.memory_space<vmem>>, %arg7: memref<1x2xf32, #tpu.memory_space<vmem>>, %arg8: memref<1x2xf32, #tpu.memory_space<vmem>>, %arg9: memref<1x2xf32, #tpu.memory_space<vmem>>, %arg10: memref<8x2xf32, #tpu.memory_space<vmem>>) attributes {dimension_semantics = [#tpu.dimension_semantics<parallel>], iteration_bounds = array<i64: 1>, scalar_prefetch = 0 : i64, scratch_operands = 0 : i64, tpu.core_type = #tpu.core_type<tc>, window_params = [{transform_indices = @transform_0, window_bounds = array<i64: 8, 20>}, {pipeline_mode = #tpu.pipeline_mode<synchronous>, transform_indices = @transform_1, window_bounds = array<i64: 16, 256>}, {pipeline_mode = #tpu.pipeline_mode<synchronous>, transform_indices = @transform_2, window_bounds = array<i64: 1, 256>}, {pipeline_mode = #tpu.pipeline_mode<synchronous>, transform_indices = @transform_3, window_bounds = array<i64: 256, 256>}, {pipeline_mode = #tpu.pipeline_mode<synchronous>, transform_indices = @transform_4, window_bounds = array<i64: 1, 256>}, {pipeline_mode = #tpu.pipeline_mode<synchronous>, transform_indices = @transform_5, window_bounds = array<i64: 256, 2>}, {pipeline_mode = #tpu.pipeline_mode<synchronous>, transform_indices = @transform_6, window_bounds = array<i64: 1, 2>}, {pipeline_mode = #tpu.pipeline_mode<synchronous>, transform_indices = @transform_7, window_bounds = array<i64: 1, 2>}, {pipeline_mode = #tpu.pipeline_mode<synchronous>, transform_indices = @transform_8, window_bounds = array<i64: 1, 2>}, {transform_indices = @transform_9, window_bounds = array<i64: 8, 2>}]} {
    %c0 = arith.constant 0 : index
    %c0_0 = arith.constant 0 : index
    %0 = vector.load %arg1[%c0, %c0_0] : memref<8x20xf32, #tpu.memory_space<vmem>>, vector<8x16xf32>
    %1 = arith.truncf %0 : vector<8x16xf32> to vector<8x16xbf16>
    %c0_1 = arith.constant 0 : index
    %c0_2 = arith.constant 0 : index
    %2 = vector.load %arg2[%c0_1, %c0_2] : memref<16x256xbf16, #tpu.memory_space<vmem>>, vector<16x256xbf16>
    %cst = arith.constant dense<0.000000e+00> : vector<8x256xf32>
    %3 = tpu.matmul %1, %2, %cst {dimension_numbers = #tpu.dot_dimension_numbers<[1], [0], [0], [1], [0, 0, 1, 1], [], []>} : vector<8x16xbf16>, vector<16x256xbf16>, vector<8x256xf32> -> vector<8x256xf32>
    %c0_3 = arith.constant 0 : index
    %c0_4 = arith.constant 0 : index
    %4 = vector.load %arg3[%c0_3, %c0_4] : memref<1x256xf32, #tpu.memory_space<vmem>>, vector<1x256xf32>
    %5 = vector.broadcast %4 : vector<1x256xf32> to vector<8x256xf32>
    %6 = arith.addf %3, %5 : vector<8x256xf32>
    %cst_5 = arith.constant 0.000000e+00 : f32
    %7 = vector.broadcast %cst_5 : f32 to vector<8x256xf32>
    %8 = arith.maximumf %6, %7 : vector<8x256xf32>
    %9 = arith.truncf %8 : vector<8x256xf32> to vector<8x256xbf16>
    %c0_6 = arith.constant 0 : index
    %c0_7 = arith.constant 0 : index
    %10 = vector.load %arg4[%c0_6, %c0_7] : memref<256x256xbf16, #tpu.memory_space<vmem>>, vector<256x256xbf16>
    %cst_8 = arith.constant dense<0.000000e+00> : vector<8x256xf32>
    %11 = tpu.matmul %9, %10, %cst_8 {dimension_numbers = #tpu.dot_dimension_numbers<[1], [0], [0], [1], [0, 0, 1, 1], [], []>} : vector<8x256xbf16>, vector<256x256xbf16>, vector<8x256xf32> -> vector<8x256xf32>
    %c0_9 = arith.constant 0 : index
    %c0_10 = arith.constant 0 : index
    %12 = vector.load %arg5[%c0_9, %c0_10] : memref<1x256xf32, #tpu.memory_space<vmem>>, vector<1x256xf32>
    %13 = vector.broadcast %12 : vector<1x256xf32> to vector<8x256xf32>
    %14 = arith.addf %11, %13 : vector<8x256xf32>
    %cst_11 = arith.constant 0.000000e+00 : f32
    %15 = vector.broadcast %cst_11 : f32 to vector<8x256xf32>
    %16 = arith.maximumf %14, %15 : vector<8x256xf32>
    %17 = arith.truncf %16 : vector<8x256xf32> to vector<8x256xbf16>
    %c0_12 = arith.constant 0 : index
    %c0_13 = arith.constant 0 : index
    %18 = vector.load %arg6[%c0_12, %c0_13] : memref<256x2xbf16, #tpu.memory_space<vmem>>, vector<256x2xbf16>
    %cst_14 = arith.constant dense<0.000000e+00> : vector<8x2xf32>
    %19 = tpu.matmul %17, %18, %cst_14 {dimension_numbers = #tpu.dot_dimension_numbers<[1], [0], [0], [1], [0, 0, 1, 1], [], []>} : vector<8x256xbf16>, vector<256x2xbf16>, vector<8x2xf32> -> vector<8x2xf32>
    %c0_15 = arith.constant 0 : index
    %c0_16 = arith.constant 0 : index
    %20 = vector.load %arg7[%c0_15, %c0_16] : memref<1x2xf32, #tpu.memory_space<vmem>>, vector<1x2xf32>
    %21 = vector.broadcast %20 : vector<1x2xf32> to vector<8x2xf32>
    %22 = arith.addf %19, %21 : vector<8x2xf32>
    %23 = math.tanh %22 : vector<8x2xf32>
    %c0_17 = arith.constant 0 : index
    %c0_18 = arith.constant 0 : index
    %24 = vector.load %arg8[%c0_17, %c0_18] : memref<1x2xf32, #tpu.memory_space<vmem>>, vector<1x2xf32>
    %25 = vector.broadcast %24 : vector<1x2xf32> to vector<8x2xf32>
    %26 = arith.mulf %23, %25 : vector<8x2xf32>
    %c0_19 = arith.constant 0 : index
    %c0_20 = arith.constant 0 : index
    %27 = vector.load %arg9[%c0_19, %c0_20] : memref<1x2xf32, #tpu.memory_space<vmem>>, vector<1x2xf32>
    %28 = vector.broadcast %27 : vector<1x2xf32> to vector<8x2xf32>
    %29 = arith.addf %26, %28 : vector<8x2xf32>
    %c0_21 = arith.constant 0 : index
    %c0_22 = arith.constant 0 : index
    %30 = vector.load %arg10[%c0_21, %c0_22] : memref<8x2xf32, #tpu.memory_space<vmem>>, vector<8x2xf32>
    tpu.vector_store %arg10[%c0_21, %c0_22], %29 {strides = array<i32>} : memref<8x2xf32, #tpu.memory_space<vmem>>, vector<8x2xf32>,
    return
  }
  func.func @transform_0(%arg0: i32) -> (i32, i32) {
    %c0_i32 = arith.constant 0 : i32
    %c0_i32_0 = arith.constant 0 : i32
    return %arg0, %c0_i32 : i32, i32
  }
  func.func @transform_1(%arg0: i32) -> (i32, i32) {
    %c0_i32 = arith.constant 0 : i32
    %c0_i32_0 = arith.constant 0 : i32
    %c0_i32_1 = arith.constant 0 : i32
    return %c0_i32, %c0_i32_0 : i32, i32
  }
  func.func @transform_2(%arg0: i32) -> (i32, i32) {
    %c0_i32 = arith.constant 0 : i32
    %c0_i32_0 = arith.constant 0 : i32
    %c0_i32_1 = arith.constant 0 : i32
    return %c0_i32, %c0_i32_0 : i32, i32
  }
  func.func @transform_3(%arg0: i32) -> (i32, i32) {
    %c0_i32 = arith.constant 0 : i32
    %c0_i32_0 = arith.constant 0 : i32
    %c0_i32_1 = arith.constant 0 : i32
    return %c0_i32, %c0_i32_0 : i32, i32
  }
  func.func @transform_4(%arg0: i32) -> (i32, i32) {
    %c0_i32 = arith.constant 0 : i32
    %c0_i32_0 = arith.constant 0 : i32
    %c0_i32_1 = arith.constant 0 : i32
    return %c0_i32, %c0_i32_0 : i32, i32
  }
  func.func @transform_5(%arg0: i32) -> (i32, i32) {
    %c0_i32 = arith.constant 0 : i32
    %c0_i32_0 = arith.constant 0 : i32
    %c0_i32_1 = arith.constant 0 : i32
    return %c0_i32, %c0_i32_0 : i32, i32
  }
  func.func @transform_6(%arg0: i32) -> (i32, i32) {
    %c0_i32 = arith.constant 0 : i32
    %c0_i32_0 = arith.constant 0 : i32
    %c0_i32_1 = arith.constant 0 : i32
    return %c0_i32, %c0_i32_0 : i32, i32
  }
  func.func @transform_7(%arg0: i32) -> (i32, i32) {
    %c0_i32 = arith.constant 0 : i32
    %c0_i32_0 = arith.constant 0 : i32
    %c0_i32_1 = arith.constant 0 : i32
    return %c0_i32, %c0_i32_0 : i32, i32
  }
  func.func @transform_8(%arg0: i32) -> (i32, i32) {
    %c0_i32 = arith.constant 0 : i32
    %c0_i32_0 = arith.constant 0 : i32
    %c0_i32_1 = arith.constant 0 : i32
    return %c0_i32, %c0_i32_0 : i32, i32
  }
  func.func @transform_9(%arg0: i32) -> (i32, i32) {
    %c0_i32 = arith.constant 0 : i32
    %c0_i32_0 = arith.constant 0 : i32
    return %arg0, %c0_i32 : i32, i32
  }
}

</mosaic_0001>

<bundles_post_ra>
// kernel: tpu_custom_call.1
= control target key start
LH: loop header
LB: loop body
LE: loop exit
PB: predicated region body
PF: predicated region fallthrough
CT: control target
= control target key end

     0   :  { %14 = vsyncpa [#allocation3], 0  ;;  %s743_s30 = smov [#allocation2]   ;;  %s884_s0 = inlined_call_operand.vmem [shape: f32[8,20], index: 0, kind: input, shape index: {}]   ;;  %s885_s1 = inlined_call_operand.vmem [shape: bf16[16,256], index: 1, kind: input, shape index: {}]   ;;  %s886_s2 = inlined_call_operand.vmem [shape: f32[1,256], index: 2, kind: input, shape index: {}]   ;;  %s887_s3 = inlined_call_operand.hbm [shape: bf16[256,256], index: 3, kind: input, shape index: {}]   ;;  %s888_s4 = inlined_call_operand.vmem [shape: f32[1,256], index: 4, kind: input, shape index: {}]   ;;  %s889_s5 = inlined_call_operand.vmem [shape: bf16[256,2], index: 5, kind: input, shape index: {}]   ;;  %s890_s6 = inlined_call_operand.vmem [shape: f32[1,2], index: 6, kind: input, shape index: {}]   ;;  %s891_s7 = inlined_call_operand.vmem [shape: f32[1,2], index: 7, kind: input, shape index: {}]   ;;  %s892_s8 = inlined_call_operand.vmem [shape: f32[1,2], index: 8, kind: input, shape index: {}]   ;;  %s893_s9 = inlined_call_operand.vmem [shape: f32[8,2], index: 9, kind: output, shape index: {}]  }
   0x1   :  { %s26_s10 = sshll.u32 %s743_s30, 4  ;;  %s719_s13 = scalar_lea.hbm %s887_s3, 4096  ;;  %s27_s10 = int_to_ptr.vmem [resolvable:$true] %s26_s10 }
   0x2   :  { %p720_p0 = scmp.ne.s32.totalorder %s887_s3, %s719_s13  ;;  %p723_p1 = scmp.lt.u32.totalorder %s719_s13, %s887_s3 }
   0x4   :  { %p725_p2 = pnand %p723_p1, %p720_p0 }
   0x6   :  { %728 = shalt.err (!%p725_p2)
}
   0x7   :  { %s729_s18 = scalar_lea.vmem %s27_s10, 4096  ;;  %p734_p4 = scmp.lt.s32.totalorder %s27_s10, %s27_s10 }
   0x8   :  { %p730_p3 = scmp.ne.s32.totalorder %s27_s10, %s729_s18  ;;  %p735_p5 = scmp.lt.s32.totalorder %s729_s18, %s729_s18 }
   0xa   :  { %p736_p6 = por %p735_p5, %p734_p4 }
   0xc   :  { %p737_p7 = pnand %p736_p6, %p730_p3 }
   0xe   :  { %740 = shalt.err (!%p737_p7)
}
   0xf   :  { %s744_s19 = smov 128   ;;  %s745_s20 = smov 8  }
  0x10   :  { %32 = dma.hbm_to_vmem [thread:$0]  %s887_s3, 4096, %s27_s10, [#allocation3], %s744_s19, %s744_s19, %s745_s20  }
  0x11   :  { %741 = dma.done.wait [#allocation3], 4096  }
  0x12   :  { %742 = vsyncadd [#allocation3], 4294963200  ;;  %v746_v0 = vmov 0   ;;  %v650_v1 = vld [vmem:[%s885_s1 + $0x4] ss:$8 sps:$4 sm:$0xff]   ;;  %vm73_vm0 = vcmask 130048   ;;  %v53_v49 = vlaneseq }
  0x13   :  { %109 = vmatprep.mubr.bf16.mxu0 %v746_v0  ;;  %v652_v2 = vld [vmem:[%s885_s1] ss:$8 sps:$4 sm:$0xff]   ;;  %77 = vmatprep.subr.bf16.mxu0 %v650_v1  ;;  %v653_v5 = vld [vmem:[#allocation2 + $0x4] ss:$8 sps:$4 sm:$0xff]   ;;  %v656_v7 = vld [vmem:[#allocation2 + $0x14] ss:$8 sps:$4 sm:$0xff]  }
  0x14   :  { %v47_v3 = vld [vmem:[%s884_s0] sm:$0xff]  ;;  %78 = vmatpush1.bf16.msra.mxu0 %v652_v2  ;;  %326 = vmatprep.subr.bf16.mxu1 %v653_v5  ;;  %v658_v8 = vld [vmem:[#allocation2 + $0x10] ss:$8 sps:$4 sm:$0xff]   ;;  %v662_v11 = vld [vmem:[#allocation2 + $0x34] ss:$8 sps:$4 sm:$0xff]   ;;  %v54_v50 = vshrl.u32 %v53_v49, 7 }
  0x15   :  { %v48_v4 = vpack.c.bf16 %v47_v3, %v47_v3  ;;  %v655_v6 = vld [vmem:[#allocation2] ss:$8 sps:$4 sm:$0xff]   ;;  %v659_v9 = vld [vmem:[#allocation2 + $0x24] ss:$8 sps:$4 sm:$0xff]   ;;  %v664_v12 = vld [vmem:[#allocation2 + $0x30] ss:$8 sps:$4 sm:$0xff]  }
  0x16   :  { %327 = vmatpush1.bf16.msra.mxu1 %v655_v6  ;;  %v661_v10 = vld [vmem:[#allocation2 + $0x20] ss:$8 sps:$4 sm:$0xff]   ;;  %v665_v13 = vld [vmem:[#allocation2 + $0x44] ss:$8 sps:$4 sm:$0xff]   ;;  %v668_v15 = vld [vmem:[#allocation2 + $0x54] ss:$8 sps:$4 sm:$0xff]  }
  0x17   :  { %572 = vmatmul.mubr.msk.bf16.vlgmr.msra.gmra.mrb[0].mxu0 %vm73_vm0, %v48_v4  ;;  %328 = vmatprep.subr.bf16.mxu1 %v656_v7  ;;  %v667_v14 = vld [vmem:[#allocation2 + $0x40] ss:$8 sps:$4 sm:$0xff]   ;;  %v670_v16 = vld [vmem:[#allocation2 + $0x50] ss:$8 sps:$4 sm:$0xff]   ;;  %v671_v17 = vld [vmem:[#allocation2 + $0x64] ss:$8 sps:$4 sm:$0xff]  }
  0x18   :  { %v673_v18 = vld [vmem:[#allocation2 + $0x60] ss:$8 sps:$4 sm:$0xff]   ;;  %v674_v19 = vld [vmem:[#allocation2 + $0x74] ss:$8 sps:$4 sm:$0xff]   ;;  %v676_v20 = vld [vmem:[#allocation2 + $0x70] ss:$8 sps:$4 sm:$0xff]  }
  0x19   :  { %v677_v21 = vld [vmem:[#allocation2 + $0x84] ss:$8 sps:$4 sm:$0xff]   ;;  %v679_v22 = vld [vmem:[#allocation2 + $0x80] ss:$8 sps:$4 sm:$0xff]   ;;  %v680_v23 = vld [vmem:[#allocation2 + $0x94] ss:$8 sps:$4 sm:$0xff]  }
  0x1a   :  { %329 = vmatpush1.bf16.msra.mxu1 %v658_v8  ;;  %v682_v24 = vld [vmem:[#allocation2 + $0x90] ss:$8 sps:$4 sm:$0xff]   ;;  %v683_v25 = vld [vmem:[#allocation2 + $0xa4] ss:$8 sps:$4 sm:$0xff]   ;;  %v685_v26 = vld [vmem:[#allocation2 + $0xa0] ss:$8 sps:$4 sm:$0xff]  }
  0x1b   :  { %330 = vmatprep.subr.bf16.mxu1 %v659_v9  ;;  %v686_v27 = vld [vmem:[#allocation2 + $0xb4] ss:$8 sps:$4 sm:$0xff]   ;;  %v688_v28 = vld [vmem:[#allocation2 + $0xb0] ss:$8 sps:$4 sm:$0xff]   ;;  %v689_v29 = vld [vmem:[#allocation2 + $0xc4] ss:$8 sps:$4 sm:$0xff]  }
  0x1c   :  { %v691_v30 = vld [vmem:[#allocation2 + $0xc0] ss:$8 sps:$4 sm:$0xff]   ;;  %v692_v31 = vld [vmem:[#allocation2 + $0xd4] ss:$8 sps:$4 sm:$0xff]   ;;  %v694_v32 = vld [vmem:[#allocation2 + $0xd0] ss:$8 sps:$4 sm:$0xff]  }
  0x1d   :  { %v695_v33 = vld [vmem:[#allocation2 + $0xe4] ss:$8 sps:$4 sm:$0xff]   ;;  %v697_v34 = vld [vmem:[#allocation2 + $0xe0] ss:$8 sps:$4 sm:$0xff]   ;;  %v698_v35 = vld [vmem:[#allocation2 + $0xf4] ss:$8 sps:$4 sm:$0xff]  }
  0x1e   :  { %331 = vmatpush1.bf16.msra.mxu1 %v661_v10  ;;  %v700_v36 = vld [vmem:[#allocation2 + $0xf0] ss:$8 sps:$4 sm:$0xff]   ;;  %v701_v37 = vld [vmem:[%s889_s5 + $0x40] sm:$0xff]   ;;  %v703_v39 = vld [vmem:[%s889_s5 + $0x48] sm:$0xff]   ;;  %v55_v51 = vsub.s32 0, %v54_v50  ;;  %v59_v53 = vsub.s32 1, %v54_v50 }
  0x1f   :  { %332 = vmatprep.subr.bf16.mxu1 %v662_v11  ;;  %v702_v38 = vld [vmem:[%s889_s5] sm:$0xff]   ;;  %624 = vmatprep.subr.bf16.mxu0 %v701_v37  ;;  %v704_v40 = vld [vmem:[%s889_s5 + $0x8] sm:$0xff]   ;;  %v705_v41 = vld [vmem:[%s889_s5 + $0x50] sm:$0xff]   ;;  %vm563_vm1 = vcmask 15360  }
  0x20   :  { %625 = vmatpush3.bf16.msra.mxu0 %v702_v38  ;;  %v706_v42 = vld [vmem:[%s889_s5 + $0x10] sm:$0xff]   ;;  %v707_v43 = vld [vmem:[%s889_s5 + $0x58] sm:$0xff]   ;;  %v709_v45 = vld [vmem:[%s889_s5 + $0x60] sm:$0xff]  }
  0x21   :  { %626 = vmatprep.subr.bf16.mxu0 %v703_v39  ;;  %v708_v44 = vld [vmem:[%s889_s5 + $0x18] sm:$0xff]   ;;  %v710_v46 = vld [vmem:[%s889_s5 + $0x20] sm:$0xff]   ;;  %v711_v47 = vld [vmem:[%s889_s5 + $0x68] sm:$0xff]  }
  0x22   :  { %333 = vmatpush1.bf16.msra.mxu1 %v664_v12  ;;  %v712_v48 = vld [vmem:[%s889_s5 + $0x28] sm:$0xff]   ;;  %v51_v52 = vld [vmem:[%s886_s2] sm:$0x3]  ;;  %v713_v2 = vld [vmem:[%s889_s5 + $0x70] sm:$0xff]  }
  0x23   :  { %334 = vmatprep.subr.bf16.mxu1 %v665_v13  ;;  %v56_v54 = vrot.slane %v51_v52, %v55_v51  ;;  %v60_v55 = vrot.slane %v51_v52, %v59_v53  ;;  %v714_v3 = vld [vmem:[%s889_s5 + $0x30] sm:$0xff]   ;;  %v715_v4 = vld [vmem:[%s889_s5 + $0x78] sm:$0xff]   ;;  %v154_v6 = vld [vmem:[%s888_s4] sm:$0x3] }
  0x24   :  { %627 = vmatpush3.bf16.msra.mxu0 %v704_v40  ;;  %v716_v5 = vld [vmem:[%s889_s5 + $0x38] sm:$0xff]   ;;  %v159_v7 = vrot.slane %v154_v6, %v55_v51  ;;  %v163_v8 = vrot.slane %v154_v6, %v59_v53 }
  0x25   :  { %628 = vmatprep.subr.bf16.mxu0 %v705_v41 }
  0x26   :  { %335 = vmatpush1.bf16.msra.mxu1 %v667_v14 }
  0x27   :  { %336 = vmatprep.subr.bf16.mxu1 %v668_v15 }
  0x28   :  { %629 = vmatpush3.bf16.msra.mxu0 %v706_v42 }
  0x29   :  { %630 = vmatprep.subr.bf16.mxu0 %v707_v43 }
  0x2a   :  { %337 = vmatpush1.bf16.msra.mxu1 %v670_v16 }
  0x2b   :  { %338 = vmatprep.subr.bf16.mxu1 %v671_v17 }
  0x2c   :  { %631 = vmatpush3.bf16.msra.mxu0 %v708_v44 }
  0x2d   :  { %632 = vmatprep.subr.bf16.mxu0 %v709_v45 }
  0x2e   :  { %339 = vmatpush1.bf16.msra.mxu1 %v673_v18 }
  0x2f   :  { %340 = vmatprep.subr.bf16.mxu1 %v674_v19 }
  0x30   :  { %633 = vmatpush3.bf16.msra.mxu0 %v710_v46 }
  0x31   :  { %634 = vmatprep.subr.bf16.mxu0 %v711_v47 }
  0x32   :  { %341 = vmatpush1.bf16.msra.mxu1 %v676_v20  ;;  %v605_v20 = vld [vmem:[%s890_s6] ss:$0 sm:$0xff] }
  0x33   :  { %342 = vmatprep.subr.bf16.mxu1 %v677_v21 }
  0x34   :  { %635 = vmatpush3.bf16.msra.mxu0 %v712_v48 }
  0x35   :  { %636 = vmatprep.subr.bf16.mxu0 %v713_v2 }
  0x36   :  { %343 = vmatpush1.bf16.msra.mxu1 %v679_v22 }
  0x37   :  { %344 = vmatprep.subr.bf16.mxu1 %v680_v23 }
  0x38   :  { %637 = vmatpush3.bf16.msra.mxu0 %v714_v3 }
  0x39   :  { %638 = vmatprep.subr.bf16.mxu0 %v715_v4 }
  0x3a   :  { %345 = vmatpush1.bf16.msra.mxu1 %v682_v24 }
  0x3b   :  { %346 = vmatprep.subr.bf16.mxu1 %v683_v25 }
  0x3c   :  { %639 = vmatpush3.bf16.msra.mxu0 %v716_v5 }
  0x3e   :  { %347 = vmatpush1.bf16.msra.mxu1 %v685_v26  ;;  %v622_v26 = vld [vmem:[%s891_s7] ss:$0 sm:$0xff] }
  0x3f   :  { %348 = vmatprep.subr.bf16.mxu1 %v686_v27 }
  0x42   :  { %349 = vmatpush1.bf16.msra.mxu1 %v688_v28  ;;  %v623_v28 = vld [vmem:[%s892_s8] ss:$0 sm:$0xff] }
  0x43   :  { %350 = vmatprep.subr.bf16.mxu1 %v689_v29 }
  0x46   :  { %351 = vmatpush1.bf16.msra.mxu1 %v691_v30 }
  0x47   :  { %352 = vmatprep.subr.bf16.mxu1 %v692_v31 }
  0x4a   :  { %353 = vmatpush1.bf16.msra.mxu1 %v694_v32 }
  0x4b   :  { %354 = vmatprep.subr.bf16.mxu1 %v695_v33 }
  0x4e   :  { %355 = vmatpush1.bf16.msra.mxu1 %v697_v34 }
  0x4f   :  { %356 = vmatprep.subr.bf16.mxu1 %v698_v35 }
  0x52   :  { %357 = vmatpush1.bf16.msra.mxu1 %v700_v36 }
  0xea   :  { %v111_v56 = vpop.f32.mrb[0].mxu0 }
  0xeb   :  { %v112_v57 = vadd.f32 %v111_v56, %v56_v54  ;;  %v113_v58 = vpop.f32.mrb[1].mxu0 }
  0xec   :  { %v114_v59 = vadd.f32 %v113_v58, %v60_v55  ;;  %v115_v60 = vpop.f32.mrb[2].mxu0 }
  0xed   :  { %v118_v61 = vmax.f32 %v112_v57, 0.0  ;;  %v116_v62 = vpop.f32.mrb[3].mxu0 }
  0xee   :  { %v119_v63 = vmax.f32 %v114_v59, 0.0 }
  0xef   :  { %v120_v1 = vpack.c.bf16 %v118_v61, %v118_v61 }
  0xf0   :  { %v121_v0 = vpack.c.bf16 %v119_v63, %v119_v63 }
  0xf2   :  { %358 = vmatprep.mubr.bf16.mxu1 %v121_v0 }
  0xf3   :  { %359 = vmatmul.mubr.bf16.vlgmr.msra.gmra.mrb[0].mxu1 %v120_v1 }
 0x1c6   :  { %v360_v9 = vpop.f32.mrb[0].mxu1 }
 0x1c7   :  { %v361_v10 = vadd.f32 %v360_v9, %v159_v7  ;;  %v362_v11 = vpop.f32.mrb[1].mxu1 }
 0x1c8   :  { %v363_v12 = vadd.f32 %v362_v11, %v163_v8  ;;  %v364_v13 = vpop.f32.mrb[2].mxu1 }
 0x1c9   :  { %v367_v14 = vmax.f32 %v361_v10, 0.0  ;;  %v365_v15 = vpop.f32.mrb[3].mxu1 }
 0x1ca   :  { %v368_v16 = vmax.f32 %v363_v12, 0.0 }
 0x1cb   :  { %v369_v18 = vpack.c.bf16 %v367_v14, %v367_v14 }
 0x1cc   :  { %v370_v17 = vpack.c.bf16 %v368_v16, %v368_v16 }
 0x1ce   :  { %538 = vmatprep.mubr.bf16.mxu0 %v370_v17 }
 0x1cf   :  { %539 = vmatmul.mubr.bf16.vlgmr.msra.gmra.mrb[4].mxu0 %v369_v18 }
 0x2a2   :  { %v640_v19 = vpop.f32.mrb[4].mxu0 }
 0x2a3   :  { %v641_v21 = vpop.f32.mrb[5].mxu0 }
 0x2a4   :  { %v642_v22 = vadd.f32 %v641_v21, %v640_v19  ;;  %v643_v23 = vpop.f32.mrb[6].mxu0 }
 0x2a5   :  { %v644_v24 = vpop.f32.mrb[7].mxu0 }
 0x2a6   :  { %v541_v25 = vadd.f32 %v642_v22, %v605_v20 }
 0x2a8   :  { %717 = vtanh.f32 %v541_v25 }
 0x2b2   :  { %v718_v27 = vpop.eup %717 }
 0x2b3   :  { %v554_v29 = vmul.f32 %v718_v27, %v622_v26 }
 0x2b5   :  { %v562_v30 = vadd.f32 %v623_v28, %v554_v29 }
 0x2b7   :  { %564 = vst.msk [vmem:[%s893_s9] sm:$0xff] %vm563_vm1, %v562_v30 }
 0x2b8   :  { %569 = vsyncpa [#allocation3], 1 }

</bundles_post_ra>
